<compile_context>
chip_gen: v7x
topology: tpu7x:2x2x1
jax: 0.10.0
libtpu: 0.0.40
codegen_flags: <defaults>
</compile_context>

<pallas_src>
import functools
import numpy as np

import jax
import jax.numpy as jnp
from jax import lax
from jax.experimental import pallas as pl
from jax.experimental.pallas import tpu as pltpu

NORM_EPS = 1e-6              # struct2seq Normalize(epsilon=1e-6)
EXACT_NORM = False           # True -> exact torch denominator (sqrt(var+eps)+eps)
OUT_DTYPE = jnp.float32      # bfloat16 halves writeback bytes if downstream tolerates it
TILE_NK_MAX = 2048           # edge-row tile (multiple of 8); ~4-6 MiB live VMEM at f32
VMEM_LIMIT_BYTES = 32 * 1024 * 1024


def _normalize(h, gain, bias):
    """struct2seq Normalize over the last dim (torch.var is unbiased)."""
    f = h.shape[-1]
    mu = jnp.mean(h, axis=-1, keepdims=True)
    xc = h - mu
    var = jnp.sum(xc * xc, axis=-1, keepdims=True) * (1.0 / (f - 1))
    if EXACT_NORM:
        inv = pl.reciprocal(jnp.sqrt(var + NORM_EPS) + NORM_EPS, approx=False)
    else:
        # one EUP op; drops the outer +eps -> O(eps/sigma) deviation from torch
        inv = lax.rsqrt(var + NORM_EPS)
    return gain * xc * inv + bias


# ------------------------------ node kernel ----------------------------------
def _node_kernel(v_ref, w_ref, b_ref, g_ref, beta_ref, out_ref):
    hv = jnp.dot(v_ref[...], w_ref[...], preferred_element_type=jnp.float32) + b_ref[...]
    out_ref[...] = _normalize(hv, g_ref[...], beta_ref[...]).astype(out_ref.dtype)


# ------------------------------ edge kernel ----------------------------------
def make_edge_kernel(num_rbf, p2):
    edge_in = num_rbf + 2 * p2

    def kernel(rbfarg_ref, ang_ref, w_ref, b_ref, g_ref, beta_ref, out_ref, ein_ref):
        a = rbfarg_ref[...]                      # [tile, num_rbf] = (D - mu) / sigma
        ang = ang_ref[...]                       # [tile, p2]      = (j - i) * freq
        # concat([RBF, cos, sin]) built once in a VMEM scratch -> a single
        # K = num_rbf + num_pos matmul instead of three tiny-K matmuls.
        ein_ref[:, 0:num_rbf] = jnp.exp(-(a * a))
        ein_ref[:, num_rbf:num_rbf + p2] = jnp.cos(ang)
        ein_ref[:, num_rbf + p2:edge_in] = jnp.sin(ang)
        he = jnp.dot(ein_ref[...], w_ref[...],
                     preferred_element_type=jnp.float32) + b_ref[...]
        out_ref[...] = _normalize(he, g_ref[...], beta_ref[...]).astype(out_ref.dtype)

    return kernel


# --------------------------------- wrapper -----------------------------------
def rna_features_forward(X, params, dists, E_idx, *, num_rbf=16, num_pos=16):
    """Equivalent of RNAFeatures.forward(X) -> (V, E, E_idx)."""
    bs, n_nodes = X.shape[0], X.shape[1]
    top_k = E_idx.shape[-1]
    node_features = params["w_node"].shape[1]
    edge_features = params["w_edge"].shape[1]
    p2 = num_pos // 2
    edge_in = num_rbf + num_pos
    nk = n_nodes * top_k
    assert n_nodes < (1 << 24), "neighbor offsets must stay exact in float32"

    # ----- node path (batch-invariant, tiny): single-block launch -----
    # pos[b, i] == i, so the embedding lookup is rows 0..N-1 of the table.
    v_in = params["emb_table"][:n_nodes].astype(jnp.float32)
    b_node = params["b_node"].reshape(1, node_features)
    g_node = params["gain_node"].reshape(1, node_features)
    beta_node = params["bias_node"].reshape(1, node_features)

    v_single = pl.pallas_call(
        _node_kernel,
        out_shape=jax.ShapeDtypeStruct((n_nodes, node_features), OUT_DTYPE),
    )(v_in, params["w_node"].astype(jnp.float32), b_node, g_node, beta_node)

    # ----- edge path: pre-scaled side inputs, tiled + parallel over nk rows -----
    d_min, d_max = 0.0, 20.0
    inv_sigma = float(num_rbf) / (d_max - d_min)                       # 1 / D_sigma
    mu = jnp.linspace(d_min, d_max, num_rbf, dtype=jnp.float32)[None, :]
    freq = jnp.exp(jnp.arange(0, num_pos, 2, dtype=jnp.float32)
                   * (-(np.log(10000.0) / num_pos)))[None, :]

    d = dists.astype(jnp.float32).reshape(nk, 1)
    off = (E_idx.astype(jnp.float32)
           - jnp.arange(n_nodes, dtype=jnp.float32)[:, None]).reshape(nk, 1)
    rbf_arg = (d - mu) * inv_sigma                                     # [nk, num_rbf]
    ang = off * freq                                                   # [nk, p2]

    b_edge = params["b_edge"].reshape(1, edge_features)
    g_edge = params["gain_edge"].reshape(1, edge_features)
    beta_edge = params["bias_edge"].reshape(1, edge_features)
    w_edge = params["w_edge"].astype(jnp.float32)

    tile_nk = nk if nk <= TILE_NK_MAX else TILE_NK_MAX
    grid = (pl.cdiv(nk, tile_nk),)

    cost = pl.CostEstimate(
        flops=2 * nk * edge_in * edge_features,
        transcendentals=nk * (num_rbf + num_pos + 1),
        bytes_accessed=4 * (nk * (num_rbf + p2) + nk * edge_features
                            + edge_in * edge_features + 3 * edge_features),
    )

    e_single = pl.pallas_call(
        make_edge_kernel(num_rbf, p2),
        out_shape=jax.ShapeDtypeStruct((nk, edge_features), OUT_DTYPE),
        grid_spec=pltpu.PrefetchScalarGridSpec(
            num_scalar_prefetch=0,
            grid=grid,
            in_specs=[
                pl.BlockSpec((tile_nk, num_rbf), lambda i: (i, 0)),
                pl.BlockSpec((tile_nk, p2), lambda i: (i, 0)),
                # weights / norm params: constant index_map -> VMEM-resident
                pl.BlockSpec((edge_in, edge_features), lambda i: (0, 0)),
                pl.BlockSpec((1, edge_features), lambda i: (0, 0)),
                pl.BlockSpec((1, edge_features), lambda i: (0, 0)),
                pl.BlockSpec((1, edge_features), lambda i: (0, 0)),
            ],
            out_specs=pl.BlockSpec((tile_nk, edge_features), lambda i: (i, 0)),
            scratch_shapes=[pltpu.VMEM((tile_nk, edge_in), jnp.float32)],
        ),
        compiler_params=pltpu.CompilerParams(
            dimension_semantics=("parallel",),
            vmem_limit_bytes=VMEM_LIMIT_BYTES,
        ),
        cost_estimate=cost,
    )(rbf_arg, ang, w_edge, b_edge, g_edge, beta_edge)

    # Batch dim is a pure broadcast (module outputs are independent of X values).
    V = jnp.broadcast_to(v_single[None], (bs, n_nodes, node_features))
    E = jnp.broadcast_to(e_single.reshape(1, n_nodes, top_k, edge_features),
                         (bs, n_nodes, top_k, edge_features))
    # torch returns int64; JAX uses int32 here (values identical).
    E_idx_out = jnp.broadcast_to(E_idx[None].astype(jnp.int32), (bs, n_nodes, top_k))
    return V, E, E_idx_out


# ------------------------------ params / reference ---------------------------
def init_params(key, *, block_size, num_node_embeddings, node_features,
                num_positional_embeddings, num_rbf, edge_features):
    edge_in = num_positional_embeddings + num_rbf
    k1, k2, k3, k4, k5 = jax.random.split(key, 5)
    return {
        "emb_table": jax.random.normal(k1, (block_size, num_node_embeddings), jnp.float32),
        "w_node": jax.random.normal(k2, (num_node_embeddings, node_features), jnp.float32)
                  * (1.0 / np.sqrt(num_node_embeddings)),
        "b_node": jax.random.normal(k3, (node_features,), jnp.float32) * 0.01,
        "gain_node": jnp.ones((node_features,), jnp.float32),
        "bias_node": jnp.zeros((node_features,), jnp.float32),
        "w_edge": jax.random.normal(k4, (edge_in, edge_features), jnp.float32)
                  * (1.0 / np.sqrt(edge_in)),
        "b_edge": jax.random.normal(k5, (edge_features,), jnp.float32) * 0.01,
        "gain_edge": jnp.ones((edge_features,), jnp.float32),
        "bias_edge": jnp.zeros((edge_features,), jnp.float32),
    }


def _reference(X, params, dists, E_idx, num_rbf, num_pos):
    """Plain-JAX replica of the torch forward (sanity check)."""
    bs, n = X.shape[0], X.shape[1]

    def norm(h, g, b):
        mu = h.mean(-1, keepdims=True)
        var = ((h - mu) ** 2).sum(-1, keepdims=True) / (h.shape[-1] - 1)
        s = jnp.sqrt(var + NORM_EPS)
        return g * (h - mu) / (s + NORM_EPS) + b

    v_in = params["emb_table"][:n]
    V1 = norm(v_in @ params["w_node"] + params["b_node"],
              params["gain_node"], params["bias_node"])

    mu_r = jnp.linspace(0.0, 20.0, num_rbf)
    sig = 20.0 / num_rbf
    rbf = jnp.exp(-(((dists[..., None] - mu_r) / sig) ** 2))
    ii = jnp.arange(n, dtype=jnp.float32)[:, None]
    d = (E_idx.astype(jnp.float32) - ii)[..., None]
    freq = jnp.exp(jnp.arange(0, num_pos, 2, dtype=jnp.float32)
                   * (-(np.log(10000.0) / num_pos)))
    ang = d * freq
    e_in = jnp.concatenate([rbf, jnp.cos(ang), jnp.sin(ang)], -1)
    E1 = norm(e_in @ params["w_edge"] + params["b_edge"],
              params["gain_edge"], params["bias_edge"])
    V = jnp.broadcast_to(V1[None], (bs,) + V1.shape)
    E = jnp.broadcast_to(E1[None], (bs,) + E1.shape)
    return V, E


# ----------------------------------- main -------------------------------------
if __name__ == "__main__":
    # small shapes consistent with the module
    bs, n_nodes, top_k = 2, 16, 8
    num_rbf = 16
    num_positional_embeddings = 16
    num_node_embeddings = 16
    node_features = 32
    edge_features = 32
    block_size = 256

    key = jax.random.PRNGKey(0)
    kx, kc, kp = jax.random.split(key, 3)

    # forward input: only X.shape[0], X.shape[1] are used by the module
    X = jax.random.normal(kx, (bs, n_nodes, 3), jnp.float32)

    # __init__-time dist_map and top-k smallest neighbors (plain-JAX glue)
    coords = jax.random.normal(kc, (n_nodes, 3), jnp.float32) * 5.0
    dist_map = jnp.sqrt(jnp.sum((coords[:, None, :] - coords[None, :, :]) ** 2, -1) + 1e-9)
    E_idx = jnp.argsort(dist_map, axis=-1)[:, :top_k].astype(jnp.int32)  # torch.topk largest=False
    dists = jnp.take_along_axis(dist_map, E_idx, axis=-1)

    params = init_params(
        kp,
        block_size=block_size,
        num_node_embeddings=num_node_embeddings,
        node_features=node_features,
        num_positional_embeddings=num_positional_embeddings,
        num_rbf=num_rbf,
        edge_features=edge_features,
    )

    fwd = functools.partial(rna_features_forward,
                            num_rbf=num_rbf, num_pos=num_positional_embeddings)
    V, E, E_idx_out = fwd(X, params, dists, E_idx)
    jax.block_until_ready((V, E, E_idx_out))

    assert V.shape == (bs, n_nodes, node_features)
    assert E.shape == (bs, n_nodes, top_k, edge_features)
    assert E_idx_out.shape == (bs, n_nodes, top_k)

    # sanity check against a plain-JAX reference (loose tolerance: MXU f32 + rsqrt)
    V_ref, E_ref = _reference(X, params, dists, E_idx, num_rbf, num_positional_embeddings)
    np.testing.assert_allclose(np.asarray(V), np.asarray(V_ref), rtol=3e-2, atol=3e-2)
    np.testing.assert_allclose(np.asarray(E), np.asarray(E_ref), rtol=3e-2, atol=3e-2)

    print("KERNEL_OK")
</pallas_src>

<mosaic_0001>
module attributes {stable_mosaic.version = 11 : i64} {
  func.func @_node_kernel(%arg0: memref<16x16xf32, #tpu.memory_space<vmem>>, %arg1: memref<16x32xf32, #tpu.memory_space<vmem>>, %arg2: memref<1x32xf32, #tpu.memory_space<vmem>>, %arg3: memref<1x32xf32, #tpu.memory_space<vmem>>, %arg4: memref<1x32xf32, #tpu.memory_space<vmem>>, %arg5: memref<16x32xf32, #tpu.memory_space<vmem>>) attributes {dimension_semantics = [], scalar_prefetch = 0 : i64, scratch_operands = 0 : i64, tpu.core_type = #tpu.core_type<tc>} {
    %c0 = arith.constant 0 : index
    %c0_0 = arith.constant 0 : index
    %0 = vector.load %arg0[%c0, %c0_0] : memref<16x16xf32, #tpu.memory_space<vmem>>, vector<16x16xf32>
    %c0_1 = arith.constant 0 : index
    %c0_2 = arith.constant 0 : index
    %1 = vector.load %arg1[%c0_1, %c0_2] : memref<16x32xf32, #tpu.memory_space<vmem>>, vector<16x32xf32>
    %cst = arith.constant dense<0.000000e+00> : vector<16x32xf32>
    %2 = tpu.matmul %0, %1, %cst {dimension_numbers = #tpu.dot_dimension_numbers<[1], [0], [0], [1], [0, 0, 1, 1], [], []>} : vector<16x16xf32>, vector<16x32xf32>, vector<16x32xf32> -> vector<16x32xf32>
    %c0_3 = arith.constant 0 : index
    %c0_4 = arith.constant 0 : index
    %3 = vector.load %arg2[%c0_3, %c0_4] : memref<1x32xf32, #tpu.memory_space<vmem>>, vector<1x32xf32>
    %4 = vector.broadcast %3 : vector<1x32xf32> to vector<16x32xf32>
    %5 = arith.addf %2, %4 : vector<16x32xf32>
    %c0_5 = arith.constant 0 : index
    %c0_6 = arith.constant 0 : index
    %6 = vector.load %arg3[%c0_5, %c0_6] : memref<1x32xf32, #tpu.memory_space<vmem>>, vector<1x32xf32>
    %c0_7 = arith.constant 0 : index
    %c0_8 = arith.constant 0 : index
    %7 = vector.load %arg4[%c0_7, %c0_8] : memref<1x32xf32, #tpu.memory_space<vmem>>, vector<1x32xf32>
    %cst_9 = arith.constant dense<0.000000e+00> : vector<16xf32>
    %8 = vector.multi_reduction <add>, %5, %cst_9 [1] : vector<16x32xf32> to vector<16xf32>
    %9 = vector.shape_cast %8 : vector<16xf32> to vector<16x1xf32>
    %cst_10 = arith.constant 3.200000e+01 : f32
    %10 = vector.broadcast %cst_10 : f32 to vector<16x1xf32>
    %11 = arith.divf %9, %10 : vector<16x1xf32>
    %12 = vector.broadcast %11 : vector<16x1xf32> to vector<16x32xf32>
    %13 = arith.subf %5, %12 : vector<16x32xf32>
    %14 = arith.mulf %13, %13 : vector<16x32xf32>
    %cst_11 = arith.constant dense<0.000000e+00> : vector<16xf32>
    %15 = vector.multi_reduction <add>, %14, %cst_11 [1] : vector<16x32xf32> to vector<16xf32>
    %16 = vector.shape_cast %15 : vector<16xf32> to vector<16x1xf32>
    %cst_12 = arith.constant 0.0322580636 : f32
    %17 = vector.broadcast %cst_12 : f32 to vector<16x1xf32>
    %18 = arith.mulf %16, %17 : vector<16x1xf32>
    %cst_13 = arith.constant 9.99999997E-7 : f32
    %19 = vector.broadcast %cst_13 : f32 to vector<16x1xf32>
    %20 = arith.addf %18, %19 : vector<16x1xf32>
    %21 = math.rsqrt %20 : vector<16x1xf32>
    %22 = vector.broadcast %6 : vector<1x32xf32> to vector<16x32xf32>
    %23 = arith.mulf %22, %13 : vector<16x32xf32>
    %24 = vector.broadcast %21 : vector<16x1xf32> to vector<16x32xf32>
    %25 = arith.mulf %23, %24 : vector<16x32xf32>
    %26 = vector.broadcast %7 : vector<1x32xf32> to vector<16x32xf32>
    %27 = arith.addf %25, %26 : vector<16x32xf32>
    %c0_14 = arith.constant 0 : index
    %c0_15 = arith.constant 0 : index
    %28 = vector.load %arg5[%c0_14, %c0_15] : memref<16x32xf32, #tpu.memory_space<vmem>>, vector<16x32xf32>
    tpu.vector_store %arg5[%c0_14, %c0_15], %27 {strides = array<i32>} : memref<16x32xf32, #tpu.memory_space<vmem>>, vector<16x32xf32>,
    return
  }
}

</mosaic_0001>

<bundles_post_ra>
// kernel: tpu_custom_call.1
= control target key start
LH: loop header
LB: loop body
LE: loop exit
PB: predicated region body
PF: predicated region fallthrough
CT: control target
= control target key end

     0   :  { %10 = vsyncpa [#allocation3], 0  ;;  %s404_s0 = inlined_call_operand.hbm [shape: f32[16,16], index: 0, kind: input, shape index: {}]   ;;  %s405_s1 = inlined_call_operand.hbm [shape: f32[16,32], index: 1, kind: input, shape index: {}]   ;;  %s406_s2 = inlined_call_operand.vmem [shape: f32[1,32], index: 2, kind: input, shape index: {}]   ;;  %s407_s3 = inlined_call_operand.vmem [shape: f32[1,32], index: 3, kind: input, shape index: {}]   ;;  %s408_s4 = inlined_call_operand.vmem [shape: f32[1,32], index: 4, kind: input, shape index: {}]   ;;  %s409_s5 = inlined_call_operand.hbm [shape: f32[16,32], index: 5, kind: output, shape index: {}]  }
   0x1   :  { %11 = vsyncpa [#allocation6], 0 }
   0x2   :  { %12 = vsyncpa [#allocation4], 0  ;;  %s309_s18 = smov [#allocation2]   ;;  %s237_s22 = scalar_lea.hbm %s404_s0, 256 }
   0x3   :  { %s18_s19 = sshll.u32 %s309_s18, 4  ;;  %p238_p0 = scmp.ne.s32.totalorder %s404_s0, %s237_s22  ;;  %s19_s19 = int_to_ptr.vmem [resolvable:$true] %s18_s19 }
   0x4   :  { %p241_p1 = scmp.lt.u32.totalorder %s237_s22, %s404_s0 }
   0x6   :  { %p243_p2 = pnand %p241_p1, %p238_p0 }
   0x8   :  { %246 = shalt.err (!%p243_p2)
}
   0x9   :  { %s247_s27 = scalar_lea.vmem %s19_s19, 256  ;;  %p252_p4 = scmp.lt.s32.totalorder %s19_s19, %s19_s19 }
   0xa   :  { %p248_p3 = scmp.ne.s32.totalorder %s19_s19, %s247_s27  ;;  %p253_p5 = scmp.lt.s32.totalorder %s247_s27, %s247_s27 }
   0xc   :  { %p254_p6 = por %p253_p5, %p252_p4 }
   0xe   :  { %p255_p7 = pnand %p254_p6, %p248_p3 }
  0x10   :  { %258 = shalt.err (!%p255_p7)
}
  0x11   :  { %s310_s28 = smov 128   ;;  %s311_s29 = smov 8  }
  0x12   :  { %24 = dma.hbm_to_vmem [thread:$0]  %s404_s0, 256, %s19_s19, [#allocation3], %s310_s28, %s310_s28, %s311_s29  }
  0x13   :  { %s312_s7 = smov [#allocation5]   ;;  %s259_s11 = scalar_lea.hbm %s405_s1, 256 }
  0x14   :  { %s30_s8 = sshll.u32 %s312_s7, 4  ;;  %p260_p8 = scmp.ne.s32.totalorder %s405_s1, %s259_s11  ;;  %s31_s8 = int_to_ptr.vmem [resolvable:$true] %s30_s8 }
  0x15   :  { %p263_p9 = scmp.lt.u32.totalorder %s259_s11, %s405_s1 }
  0x17   :  { %p265_p10 = pnand %p263_p9, %p260_p8 }
  0x19   :  { %268 = shalt.err (!%p265_p10)
}
  0x1a   :  { %s269_s16 = scalar_lea.vmem %s31_s8, 256  ;;  %p274_p12 = scmp.lt.s32.totalorder %s31_s8, %s31_s8 }
  0x1b   :  { %p270_p11 = scmp.ne.s32.totalorder %s31_s8, %s269_s16  ;;  %p275_p13 = scmp.lt.s32.totalorder %s269_s16, %s269_s16 }
  0x1d   :  { %p276_p0 = por %p275_p13, %p274_p12 }
  0x1f   :  { %p277_p1 = pnand %p276_p0, %p270_p11 }
  0x21   :  { %280 = shalt.err (!%p277_p1)
}
  0x22   :  { %36 = dma.hbm_to_vmem [thread:$0]  %s405_s1, 256, %s31_s8, [#allocation6], %s310_s28, %s310_s28, %s311_s29  }
  0x23   :  { %303 = dma.done.wait [#allocation3], 256  }
  0x24   :  { %304 = vsyncadd [#allocation3], 4294967040 }
  0x25   :  { %305 = dma.done.wait [#allocation6], 256  }
  0x26   :  { %306 = vsyncadd [#allocation6], 4294967040  ;;  %vm60_vm0 = vcmask 130048   ;;  %v51_v0 = vld [vmem:[#allocation5] sm:$0xff]  ;;  %v52_v1 = vld [vmem:[#allocation5 + $0x8] sm:$0xff]  ;;  %vm144_vm1 = vcmask 261120  }
  0x27   :  { %v49_v2 = vld [vmem:[#allocation2] sm:$0xff]  ;;  %v224_v3 = vpack.c.bf16 %v52_v1, %v51_v0  ;;  %v50_v4 = vld [vmem:[#allocation2 + $0x8] sm:$0xff]  ;;  %s313_s22 = smov [#allocation7]  }
  0x28   :  { %221 = vmatprep.mubr.msk.f32.mxu0 %vm60_vm0, %v49_v2  ;;  %v208_v5 = vld [vmem:[%s406_s2] ss:$0 sm:$0xff]  ;;  %s195_s23 = sshll.u32 %s313_s22, 4  ;;  %s196_s23 = int_to_ptr.vmem [resolvable:$true] %s195_s23 }
  0x29   :  { %225 = vmatprep.subr.bf16.mxu0 %v224_v3  ;;  %v211_v28 = vld [vmem:[%s407_s3] ss:$0 sm:$0xff]  ;;  %s281_s3 = scalar_lea.vmem %s196_s23, 256  ;;  %p286_p3 = scmp.lt.s32.totalorder %s196_s23, %s196_s23 }
  0x2a   :  { %227 = vmatpush3.bf16.msra.mxu0 %v224_v3  ;;  %v212_v31 = vld [vmem:[%s408_s4] ss:$0 sm:$0xff]  ;;  %p282_p2 = scmp.ne.s32.totalorder %s196_s23, %s281_s3  ;;  %p287_p4 = scmp.lt.s32.totalorder %s281_s3, %s281_s3 }
  0x2c   :  { %p288_p5 = por %p287_p4, %p286_p3 }
  0x2d   :  { %222 = vmatmul.mubr.msk.f32.vlgmr.msra.gmra.mrb[0].mxu0 %vm60_vm0, %v50_v4 }
  0x2e   :  { %p289_p6 = pnand %p288_p5, %p282_p2 }
 0x100   :  { %v223_v6 = vpop.f32.mrb[0].mxu0 }
 0x101   :  { %v133_v7 = vpop.f32.mrb[1].mxu0  ;;  %v139_v9 = vadd.f32 %v223_v6, %v208_v5 }
 0x102   :  { %v134_v8 = vadd.f32 %v208_v5, %v133_v7 }
 0x103   :  { %v148_v11 = vsel %vm144_vm1, %v139_v9, 0.0 }
 0x104   :  { %v145_v10 = vsel %vm144_vm1, %v134_v8, 0.0 }
 0x105   :  { %146 = vadd.xlane.f32.xlu0 %v145_v10 }
 0x109   :  { %149 = vadd.xlane.f32.xlu0 %v148_v11 }
 0x192   :  { %v147_v12 = vpop.xlane.xlu0 %146 }
 0x193   :  { %v152_v13 = vmul.f32 0.03125, %v147_v12 }
 0x195   :  { %v154_v14 = vsub.f32 %v134_v8, %v152_v13 }
 0x196   :  { %v150_v15 = vpop.xlane.xlu0 %149 }
 0x197   :  { %v153_v16 = vmul.f32 0.03125, %v150_v15  ;;  %v156_v17 = vmul.f32 %v154_v14, %v154_v14  ;;  %v176_v29 = vmul.f32 %v211_v28, %v154_v14 }
 0x199   :  { %v155_v18 = vsub.f32 %v139_v9, %v153_v16  ;;  %v158_v19 = vsel %vm144_vm1, %v156_v17, 0.0 }
 0x19a   :  { %159 = vadd.xlane.f32.xlu1 %v158_v19 }
 0x19b   :  { %v157_v20 = vmul.f32 %v155_v18, %v155_v18  ;;  %v177_v33 = vmul.f32 %v211_v28, %v155_v18 }
 0x19d   :  { %v161_v21 = vsel %vm144_vm1, %v157_v20, 0.0 }
 0x19e   :  { %162 = vadd.xlane.f32.xlu1 %v161_v21 }
 0x227   :  { %v160_v22 = vpop.xlane.xlu1 %159 }
 0x228   :  { %v164_v23 = vmul.f32 0.032258064, %v160_v22 }
 0x22a   :  { %v166_v24 = vadd.f32 1e-06, %v164_v23 }
 0x22b   :  { %v163_v25 = vpop.xlane.xlu1 %162 }
 0x22c   :  { %233 = vrsqrt.f32 %v166_v24  ;;  %v165_v26 = vmul.f32 0.032258064, %v163_v25 }
 0x22e   :  { %v167_v27 = vadd.f32 1e-06, %v165_v26 }
 0x230   :  { %235 = vrsqrt.f32 %v167_v27 }
 0x236   :  { %v234_v30 = vpop.eup %233 }
 0x237   :  { %v178_v32 = vmul.f32 %v234_v30, %v176_v29 }
 0x239   :  { %v186_v34 = vadd.f32 %v212_v31, %v178_v32 }
 0x23a   :  { %v236_v35 = vpop.eup %235 }
 0x23b   :  { %v179_v36 = vmul.f32 %v236_v35, %v177_v33  ;;  %188 = vst.msk [vmem:[#allocation7] sm:$0xff] %vm144_vm1, %v186_v34 }
 0x23d   :  { %v187_v37 = vadd.f32 %v212_v31, %v179_v36 }
 0x23f   :  { %189 = vst.msk [vmem:[#allocation7 + $0x8] sm:$0xff] %vm144_vm1, %v187_v37 }
 0x240   :  { %292 = shalt.err (!%p289_p6)
}
 0x241   :  { %s293_s25 = scalar_lea.hbm %s409_s5, 256 }
 0x242   :  { %p294_p7 = scmp.ne.s32.totalorder %s409_s5, %s293_s25  ;;  %p297_p8 = scmp.lt.u32.totalorder %s293_s25, %s409_s5 }
 0x244   :  { %p299_p9 = pnand %p297_p8, %p294_p7 }
 0x246   :  { %302 = shalt.err (!%p299_p9)
}
 0x247   :  { %201 = dma.vmem_to_hbm [thread:$0]  %s196_s23, 256, %s409_s5, [#allocation4], %s310_s28, %s310_s28, %s311_s29  }
 0x248   :  { %307 = dma.done.wait [#allocation4], 256  }
 0x249   :  { %308 = vsyncadd [#allocation4], 4294967040 }
 0x24a   :  { %205 = vsyncpa [#allocation3], 1 }
 0x24b   :  { %206 = vsyncpa [#allocation6], 1 }
 0x24c   :  { %207 = vsyncpa [#allocation4], 1 }

</bundles_post_ra>
